<compile_context>
chip_gen: v5e
topology: v5e:2x2
jax: 0.10.0
libtpu: 0.0.40
codegen_flags: <defaults>
</compile_context>

<pallas_src>
import math

import jax
import jax.numpy as jnp
from jax.experimental import pallas as pl
from jax.experimental.pallas import tpu as pltpu

GELU_C = math.sqrt(2.0 / math.pi)


def _round_up(a, b):
    return (a + b - 1) // b * b


def _mlp_kernel(x_ref, w1_ref, b1_ref, w2_ref, b2_ref, o_ref, acc_ref):
    # x_ref: (tm, E), w1_ref: (E, th), b1_ref: (1, th), w2_ref: (th, E),
    # b2_ref: (1, E), o_ref: (tm, E), acc_ref: (tm, E) f32 scratch.
    hk = pl.program_id(1)

    @pl.when(hk == 0)
    def _():
        acc_ref[...] = jnp.zeros_like(acc_ref)

    # c_fc slice: x @ W1[:, h-tile] + b1[h-tile]   (MXU, f32 accumulate)
    h = jnp.dot(x_ref[...], w1_ref[...], preferred_element_type=jnp.float32)
    h = h + b1_ref[...].astype(jnp.float32)

    # new_gelu (tanh approximation, identical to the PyTorch reference), in f32.
    h2 = h * h
    g = 0.5 * h * (1.0 + jnp.tanh(GELU_C * (h + 0.044715 * (h2 * h))))

    # Partial c_proj: accumulate g @ W2[h-tile, :] in f32.
    acc_ref[...] += jnp.dot(g.astype(w2_ref.dtype), w2_ref[...],
                            preferred_element_type=jnp.float32)

    @pl.when(hk == pl.num_programs(1) - 1)
    def _():
        # Final bias add; dropout with p=0.0 -> identity.
        o_ref[...] = (acc_ref[...] + b2_ref[...].astype(jnp.float32)).astype(o_ref.dtype)


def mlp_forward(x, w1, b1, w2, b2, *, tm=256, th=512, vmem_limit_bytes=None):
    """x: (B, T, E); w1: (E, H); b1: (H,); w2: (H, E); b2: (E,) with H = 4*E."""
    B, T, E = x.shape
    H = w1.shape[1]
    M = B * T

    # ---- pad to TPU-friendly shapes (lanes multiple of 128, sublanes of 8) ----
    Mp = _round_up(M, 8)
    tm_eff = min(tm, Mp)
    Mp = _round_up(Mp, tm_eff)

    Ep = _round_up(E, 128)
    Hp = _round_up(H, 128)
    th_eff = min(th, Hp)
    Hp = _round_up(Hp, th_eff)

    x2d = jnp.pad(x.reshape(M, E), ((0, Mp - M), (0, Ep - E)))
    w1p = jnp.pad(w1, ((0, Ep - E), (0, Hp - H)))
    b1p = jnp.pad(b1, (0, Hp - H)).reshape(1, Hp)
    w2p = jnp.pad(w2, ((0, Hp - H), (0, Ep - E)))
    b2p = jnp.pad(b2, (0, Ep - E)).reshape(1, Ep)

    # ---- VMEM budget (double-buffered inputs/outputs + scratch + headroom) ----
    def nbytes(shape, dt):
        return math.prod(shape) * jnp.dtype(dt).itemsize

    est = (2 * nbytes((tm_eff, Ep), x.dtype)        # x tile
           + 2 * nbytes((Ep, th_eff), w1.dtype)     # W1 tile
           + 2 * nbytes((1, th_eff), b1.dtype)      # b1 tile
           + 2 * nbytes((th_eff, Ep), w2.dtype)     # W2 tile
           + 2 * nbytes((1, Ep), b2.dtype)          # b2
           + 2 * nbytes((tm_eff, Ep), x.dtype)      # output tile
           + nbytes((tm_eff, Ep), jnp.float32)      # f32 accumulator scratch
           + 2 * nbytes((tm_eff, th_eff), jnp.float32))  # h / g intermediates
    if vmem_limit_bytes is None:
        # Cap at 56 MiB so the same tiling also fits v7x's 64 MiB physical VMEM.
        vmem_limit_bytes = min(max(2 * est, 32 * 1024 * 1024), 56 * 1024 * 1024)

    cost = pl.CostEstimate(
        flops=2 * 2 * Mp * Ep * Hp,                     # two matmuls
        transcendentals=Mp * Hp,                        # tanh per hidden element
        bytes_accessed=(x2d.size + w1p.size + b1p.size + w2p.size + b2p.size
                        + Mp * Ep) * jnp.dtype(x.dtype).itemsize,
    )

    out2d = pl.pallas_call(
        _mlp_kernel,
        out_shape=jax.ShapeDtypeStruct((Mp, Ep), x.dtype),
        grid_spec=pltpu.PrefetchScalarGridSpec(
            num_scalar_prefetch=0,
            grid=(Mp // tm_eff, Hp // th_eff),           # (rows, hidden reduction)
            in_specs=[
                pl.BlockSpec((tm_eff, Ep), lambda i, h: (i, 0)),   # x rows tile
                pl.BlockSpec((Ep, th_eff), lambda i, h: (0, h)),   # W1 hidden slice
                pl.BlockSpec((1, th_eff), lambda i, h: (0, h)),    # b1 hidden slice
                pl.BlockSpec((th_eff, Ep), lambda i, h: (h, 0)),   # W2 hidden slice
                pl.BlockSpec((1, Ep), lambda i, h: (0, 0)),        # b2
            ],
            out_specs=pl.BlockSpec((tm_eff, Ep), lambda i, h: (i, 0)),
            scratch_shapes=[pltpu.VMEM((tm_eff, Ep), jnp.float32)],
        ),
        compiler_params=pltpu.CompilerParams(
            dimension_semantics=("parallel", "arbitrary"),
            vmem_limit_bytes=int(vmem_limit_bytes),
        ),
        cost_estimate=cost,
    )(x2d, w1p, b1p, w2p, b2p)

    return out2d[:M, :E].reshape(B, T, E)


def _reference(x, w1, b1, w2, b2):
    h = x.astype(jnp.float32) @ w1.astype(jnp.float32) + b1.astype(jnp.float32)
    g = 0.5 * h * (1.0 + jnp.tanh(GELU_C * (h + 0.044715 * h ** 3)))
    return g @ w2.astype(jnp.float32) + b2.astype(jnp.float32)


if __name__ == "__main__":
    key = jax.random.PRNGKey(0)

    # --- case 1: small config (num_embeddings=32 -> hidden=128, batch=2, seq=8), f32 ---
    B, T, E = 2, 8, 32
    H = 4 * E
    kx, k1, k2, k3, k4, key = jax.random.split(key, 6)
    x = jax.random.normal(kx, (B, T, E), dtype=jnp.float32)
    w1 = jax.random.normal(k1, (E, H), dtype=jnp.float32) * 0.02
    b1 = jax.random.normal(k2, (H,), dtype=jnp.float32) * 0.02
    w2 = jax.random.normal(k3, (H, E), dtype=jnp.float32) * 0.02
    b2 = jax.random.normal(k4, (E,), dtype=jnp.float32) * 0.02

    out = jax.block_until_ready(mlp_forward(x, w1, b1, w2, b2))
    ref = _reference(x, w1, b1, w2, b2)
    assert out.shape == (B, T, E)
    assert jnp.allclose(out, ref, atol=1e-5, rtol=1e-5), "f32 mismatch vs reference"

    # --- case 2: exercises multi-step grid (2 row tiles x 2 hidden tiles), bf16 MXU path ---
    B2, T2, E2 = 2, 256, 256
    H2 = 4 * E2
    kx, k1, k2, k3, k4, key = jax.random.split(key, 6)
    x2 = jax.random.normal(kx, (B2, T2, E2), dtype=jnp.float32)
    w1_2 = jax.random.normal(k1, (E2, H2), dtype=jnp.float32) * 0.02
    b1_2 = jax.random.normal(k2, (H2,), dtype=jnp.float32) * 0.02
    w2_2 = jax.random.normal(k3, (H2, E2), dtype=jnp.float32) * 0.02
    b2_2 = jax.random.normal(k4, (E2,), dtype=jnp.float32) * 0.02

    out_f32 = jax.block_until_ready(mlp_forward(x2, w1_2, b1_2, w2_2, b2_2))
    ref2 = _reference(x2, w1_2, b1_2, w2_2, b2_2)
    assert jnp.allclose(out_f32, ref2, atol=1e-4, rtol=1e-4), "tiled f32 mismatch vs reference"

    out_bf16 = jax.block_until_ready(
        mlp_forward(x2.astype(jnp.bfloat16), w1_2.astype(jnp.bfloat16),
                    b1_2.astype(jnp.bfloat16), w2_2.astype(jnp.bfloat16),
                    b2_2.astype(jnp.bfloat16)))
    assert jnp.allclose(out_bf16.astype(jnp.float32), ref2, atol=5e-2, rtol=5e-2), \
        "bf16 mismatch vs reference"

    print("KERNEL_OK")
</pallas_src>

<mosaic_0001>
module attributes {stable_mosaic.version = 11 : i64} {
  func.func @_mlp_kernel(%arg0: i32, %arg1: i32, %arg2: memref<16x128xf32, #tpu.memory_space<vmem>>, %arg3: memref<128x128xf32, #tpu.memory_space<vmem>>, %arg4: memref<1x128xf32, #tpu.memory_space<vmem>>, %arg5: memref<128x128xf32, #tpu.memory_space<vmem>>, %arg6: memref<1x128xf32, #tpu.memory_space<vmem>>, %arg7: memref<16x128xf32, #tpu.memory_space<vmem>>, %arg8: memref<16x128xf32, #tpu.memory_space<vmem>>) attributes {dimension_semantics = [#tpu.dimension_semantics<parallel>, #tpu.dimension_semantics<arbitrary>], iteration_bounds = array<i64: 1, 1>, scalar_prefetch = 0 : i64, scratch_operands = 1 : i64, tpu.core_type = #tpu.core_type<tc>, window_params = [{transform_indices = @transform_0, window_bounds = array<i64: 16, 128>}, {transform_indices = @transform_1, window_bounds = array<i64: 128, 128>}, {transform_indices = @transform_2, window_bounds = array<i64: 1, 128>}, {transform_indices = @transform_3, window_bounds = array<i64: 128, 128>}, {pipeline_mode = #tpu.pipeline_mode<synchronous>, transform_indices = @transform_4, window_bounds = array<i64: 1, 128>}, {transform_indices = @transform_5, window_bounds = array<i64: 16, 128>}]} {
    %c0_i32 = arith.constant 0 : i32
    %0 = arith.cmpi eq, %arg1, %c0_i32 : i32
    %1 = arith.extui %0 : i1 to i32
    %c0_i32_0 = arith.constant 0 : i32
    %2 = arith.cmpi ne, %1, %c0_i32_0 : i32
    scf.if %2 {
      %cst_19 = arith.constant 0.000000e+00 : f32
      %30 = vector.broadcast %cst_19 : f32 to vector<16x128xf32>
      %c0_20 = arith.constant 0 : index
      %c0_21 = arith.constant 0 : index
      %31 = vector.load %arg8[%c0_20, %c0_21] : memref<16x128xf32, #tpu.memory_space<vmem>>, vector<16x128xf32>
      tpu.vector_store %arg8[%c0_20, %c0_21], %30 {strides = array<i32>} : memref<16x128xf32, #tpu.memory_space<vmem>>, vector<16x128xf32>,
    } else {
    }
    %c0 = arith.constant 0 : index
    %c0_1 = arith.constant 0 : index
    %3 = vector.load %arg2[%c0, %c0_1] : memref<16x128xf32, #tpu.memory_space<vmem>>, vector<16x128xf32>
    %c0_2 = arith.constant 0 : index
    %c0_3 = arith.constant 0 : index
    %4 = vector.load %arg3[%c0_2, %c0_3] : memref<128x128xf32, #tpu.memory_space<vmem>>, vector<128x128xf32>
    %cst = arith.constant dense<0.000000e+00> : vector<16x128xf32>
    %5 = tpu.matmul %3, %4, %cst {dimension_numbers = #tpu.dot_dimension_numbers<[1], [0], [0], [1], [0, 0, 1, 1], [], []>} : vector<16x128xf32>, vector<128x128xf32>, vector<16x128xf32> -> vector<16x128xf32>
    %c0_4 = arith.constant 0 : index
    %c0_5 = arith.constant 0 : index
    %6 = vector.load %arg4[%c0_4, %c0_5] : memref<1x128xf32, #tpu.memory_space<vmem>>, vector<1x128xf32>
    %7 = vector.broadcast %6 : vector<1x128xf32> to vector<16x128xf32>
    %8 = arith.addf %5, %7 : vector<16x128xf32>
    %9 = arith.mulf %8, %8 : vector<16x128xf32>
    %cst_6 = arith.constant 5.000000e-01 : f32
    %10 = vector.broadcast %cst_6 : f32 to vector<16x128xf32>
    %11 = arith.mulf %10, %8 : vector<16x128xf32>
    %12 = arith.mulf %9, %8 : vector<16x128xf32>
    %cst_7 = arith.constant 4.471500e-02 : f32
    %13 = vector.broadcast %cst_7 : f32 to vector<16x128xf32>
    %14 = arith.mulf %13, %12 : vector<16x128xf32>
    %15 = arith.addf %8, %14 : vector<16x128xf32>
    %cst_8 = arith.constant 0.797884583 : f32
    %16 = vector.broadcast %cst_8 : f32 to vector<16x128xf32>
    %17 = arith.mulf %16, %15 : vector<16x128xf32>
    %18 = math.tanh %17 : vector<16x128xf32>
    %cst_9 = arith.constant 1.000000e+00 : f32
    %19 = vector.broadcast %cst_9 : f32 to vector<16x128xf32>
    %20 = arith.addf %19, %18 : vector<16x128xf32>
    %21 = arith.mulf %11, %20 : vector<16x128xf32>
    %c0_10 = arith.constant 0 : index
    %c0_11 = arith.constant 0 : index
    %22 = vector.load %arg8[%c0_10, %c0_11] : memref<16x128xf32, #tpu.memory_space<vmem>>, vector<16x128xf32>
    %c0_12 = arith.constant 0 : index
    %c0_13 = arith.constant 0 : index
    %23 = vector.load %arg5[%c0_12, %c0_13] : memref<128x128xf32, #tpu.memory_space<vmem>>, vector<128x128xf32>
    %cst_14 = arith.constant dense<0.000000e+00> : vector<16x128xf32>
    %24 = tpu.matmul %21, %23, %cst_14 {dimension_numbers = #tpu.dot_dimension_numbers<[1], [0], [0], [1], [0, 0, 1, 1], [], []>} : vector<16x128xf32>, vector<128x128xf32>, vector<16x128xf32> -> vector<16x128xf32>
    %25 = arith.addf %22, %24 : vector<16x128xf32>
    %c0_15 = arith.constant 0 : index
    %c0_16 = arith.constant 0 : index
    %26 = vector.load %arg8[%c0_15, %c0_16] : memref<16x128xf32, #tpu.memory_space<vmem>>, vector<16x128xf32>
    tpu.vector_store %arg8[%c0_15, %c0_16], %25 {strides = array<i32>} : memref<16x128xf32, #tpu.memory_space<vmem>>, vector<16x128xf32>,
    %c0_i32_17 = arith.constant 0 : i32
    %27 = arith.cmpi eq, %arg1, %c0_i32_17 : i32
    %28 = arith.extui %27 : i1 to i32
    %c0_i32_18 = arith.constant 0 : i32
    %29 = arith.cmpi ne, %28, %c0_i32_18 : i32
    scf.if %29 {
      %c0_19 = arith.constant 0 : index
      %c0_20 = arith.constant 0 : index
      %30 = vector.load %arg8[%c0_19, %c0_20] : memref<16x128xf32, #tpu.memory_space<vmem>>, vector<16x128xf32>
      %c0_21 = arith.constant 0 : index
      %c0_22 = arith.constant 0 : index
      %31 = vector.load %arg6[%c0_21, %c0_22] : memref<1x128xf32, #tpu.memory_space<vmem>>, vector<1x128xf32>
      %32 = vector.broadcast %31 : vector<1x128xf32> to vector<16x128xf32>
      %33 = arith.addf %30, %32 : vector<16x128xf32>
      %c0_23 = arith.constant 0 : index
      %c0_24 = arith.constant 0 : index
      %34 = vector.load %arg7[%c0_23, %c0_24] : memref<16x128xf32, #tpu.memory_space<vmem>>, vector<16x128xf32>
      tpu.vector_store %arg7[%c0_23, %c0_24], %33 {strides = array<i32>} : memref<16x128xf32, #tpu.memory_space<vmem>>, vector<16x128xf32>,
    } else {
    }
    return
  }
  func.func @transform_0(%arg0: i32, %arg1: i32) -> (i32, i32) {
    %c0_i32 = arith.constant 0 : i32
    %c0_i32_0 = arith.constant 0 : i32
    return %arg0, %c0_i32 : i32, i32
  }
  func.func @transform_1(%arg0: i32, %arg1: i32) -> (i32, i32) {
    %c0_i32 = arith.constant 0 : i32
    %c0_i32_0 = arith.constant 0 : i32
    return %c0_i32, %arg1 : i32, i32
  }
  func.func @transform_2(%arg0: i32, %arg1: i32) -> (i32, i32) {
    %c0_i32 = arith.constant 0 : i32
    %c0_i32_0 = arith.constant 0 : i32
    return %c0_i32, %arg1 : i32, i32
  }
  func.func @transform_3(%arg0: i32, %arg1: i32) -> (i32, i32) {
    %c0_i32 = arith.constant 0 : i32
    %c0_i32_0 = arith.constant 0 : i32
    return %arg1, %c0_i32 : i32, i32
  }
  func.func @transform_4(%arg0: i32, %arg1: i32) -> (i32, i32) {
    %c0_i32 = arith.constant 0 : i32
    %c0_i32_0 = arith.constant 0 : i32
    %c0_i32_1 = arith.constant 0 : i32
    return %c0_i32, %c0_i32_0 : i32, i32
  }
  func.func @transform_5(%arg0: i32, %arg1: i32) -> (i32, i32) {
    %c0_i32 = arith.constant 0 : i32
    %c0_i32_0 = arith.constant 0 : i32
    return %arg0, %c0_i32 : i32, i32
  }
}

</mosaic_0001>

<bundles_post_ra>
// kernel: tpu_custom_call.1
= control target key start
LH: loop header
LB: loop body
LE: loop exit
PB: predicated region body
PF: predicated region fallthrough
CT: control target
= control target key end

     0   :  { %10 = vsyncpa [#allocation4], 0  ;;  %s427_s0 = inlined_call_operand.hbm [shape: f32[16,128], index: 0, kind: input, shape index: {}]   ;;  %s428_s1 = inlined_call_operand.hbm [shape: f32[128,128], index: 1, kind: input, shape index: {}]   ;;  %s429_s2 = inlined_call_operand.vmem [shape: f32[1,128], index: 2, kind: input, shape index: {}]   ;;  %s430_s3 = inlined_call_operand.hbm [shape: f32[128,128], index: 3, kind: input, shape index: {}]   ;;  %s431_s4 = inlined_call_operand.vmem [shape: f32[1,128], index: 4, kind: input, shape index: {}]   ;;  %s432_s5 = inlined_call_operand.hbm [shape: f32[16,128], index: 5, kind: output, shape index: {}]  }
   0x1   :  { %11 = vsyncpa [#allocation7], 0 }
   0x2   :  { %12 = vsyncpa [#allocation5], 0  ;;  %s30_s20 = sshll.u32 %s428_s1, 4  ;;  %s361_s21 = smov [#allocation6]   ;;  %s31_s20 = int_to_ptr.hbm [resolvable:$true] %s30_s20 }
   0x3   :  { %s32_s22 = sshll.u32 %s361_s21, 4  ;;  %s17_s25 = sshll.u32 %s427_s0, 4  ;;  %s33_s22 = int_to_ptr.vmem [resolvable:$true] %s32_s22  ;;  %s18_s25 = int_to_ptr.hbm [resolvable:$true] %s17_s25 }
   0x4   :  { %s362_s26 = smov 128   ;;  %s363_s27 = smov 8  }
   0x5   :  { %38 = dma.hbm_to_vmem [thread:$0]  %s31_s20, 2048, %s33_s22, [#allocation7], %s362_s26, %s362_s26, %s363_s27  }
   0x6   :  { %s364_s28 = smov [#allocation3]   ;;  %s45_s1 = sshll.u32 %s430_s3, 4  ;;  %s46_s1 = int_to_ptr.hbm [resolvable:$true] %s45_s1 }
   0x7   :  { %s19_s29 = sshll.u32 %s364_s28, 4  ;;  %s365_s0 = smov [#allocation8]   ;;  %s20_s29 = int_to_ptr.vmem [resolvable:$true] %s19_s29 }
   0x8   :  { %25 = dma.hbm_to_vmem [thread:$0]  %s18_s25, 256, %s20_s29, [#allocation4], %s362_s26, %s362_s26, %s363_s27  }
   0x9   :  { %s47_s7 = sshll.u32 %s365_s0, 4  ;;  %s48_s7 = int_to_ptr.vmem [resolvable:$true] %s47_s7 }
   0xa   :  { %53 = dma.hbm_to_vmem [thread:$0]  %s46_s1, 2048, %s48_s7, [#allocation7], %s362_s26, %s362_s26, %s363_s27  }
   0xb   :  { %355 = dma.done.wait [#allocation4], 256  }
   0xc   :  { %356 = vsyncadd [#allocation4], 4294967040 }
   0xd   :  { %357 = dma.done.wait [#allocation7], 4096  }
   0xe   :  { %358 = vsyncadd [#allocation7], 4294963200  ;;  %v91_v0 = vld [vmem:[#allocation6 + $0x78] sm:$0xff]  ;;  %v90_v1 = vld [vmem:[#allocation6 + $0x70] sm:$0xff]  ;;  %s366_s10 = smov [#allocation9]   ;;  %s201_s14 = sshll.u32 %s432_s5, 4  ;;  %s202_s14 = int_to_ptr.hbm [resolvable:$true] %s201_s14 }
   0xf   :  { %96 = vmatpush.msra.mxu0 %v91_v0  ;;  %215 = vmatpush.msra.mxu2 %v91_v0  ;;  %v89_v2 = vld [vmem:[#allocation6 + $0x68] sm:$0xff]  ;;  %v88_v3 = vld [vmem:[#allocation6 + $0x60] sm:$0xff]  ;;  %v87_v4 = vld [vmem:[#allocation6 + $0x58] sm:$0xff]  ;;  %s199_s11 = sshll.u32 %s366_s10, 4  ;;  %s200_s11 = int_to_ptr.vmem [resolvable:$true] %s199_s11 }
  0x10   :  { %v154_v5 = vld [vmem:[#allocation8 + $0x78] sm:$0xff]  ;;  %v153_v6 = vld [vmem:[#allocation8 + $0x70] sm:$0xff]  ;;  %v152_v8 = vld [vmem:[#allocation8 + $0x68] sm:$0xff] }
  0x11   :  { %97 = vmatpush.msra.mxu0 %v90_v1  ;;  %216 = vmatpush.msra.mxu2 %v90_v1  ;;  %v86_v7 = vld [vmem:[#allocation6 + $0x50] sm:$0xff]  ;;  %v85_v9 = vld [vmem:[#allocation6 + $0x48] sm:$0xff]  ;;  %v151_v10 = vld [vmem:[#allocation8 + $0x60] sm:$0xff] }
  0x12   :  { %155 = vmatpush.msra.mxu1 %v154_v5  ;;  %231 = vmatpush.msra.mxu3 %v154_v5  ;;  %v84_v11 = vld [vmem:[#allocation6 + $0x40] sm:$0xff]  ;;  %v83_v12 = vld [vmem:[#allocation6 + $0x38] sm:$0xff]  ;;  %v82_v13 = vld [vmem:[#allocation6 + $0x30] sm:$0xff] }
  0x13   :  { %98 = vmatpush.msra.mxu0 %v89_v2  ;;  %217 = vmatpush.msra.mxu2 %v89_v2  ;;  %v81_v14 = vld [vmem:[#allocation6 + $0x28] sm:$0xff]  ;;  %v80_v15 = vld [vmem:[#allocation6 + $0x20] sm:$0xff]  ;;  %v79_v16 = vld [vmem:[#allocation6 + $0x18] sm:$0xff] }
  0x14   :  { %156 = vmatpush.msra.mxu1 %v153_v6  ;;  %232 = vmatpush.msra.mxu3 %v153_v6  ;;  %v78_v17 = vld [vmem:[#allocation6 + $0x10] sm:$0xff]  ;;  %v77_v18 = vld [vmem:[#allocation6 + $0x8] sm:$0xff]  ;;  %v76_v19 = vld [vmem:[#allocation6] sm:$0xff] }
  0x15   :  { %99 = vmatpush.msra.mxu0 %v88_v3  ;;  %218 = vmatpush.msra.mxu2 %v88_v3  ;;  %v74_v20 = vld [vmem:[#allocation3] sm:$0xff]  ;;  %v75_v21 = vld [vmem:[#allocation3 + $0x8] sm:$0xff]  ;;  %v148_v24 = vld [vmem:[#allocation8 + $0x48] sm:$0xff] }
  0x16   :  { %157 = vmatpush.msra.mxu1 %v152_v8  ;;  %233 = vmatpush.msra.mxu3 %v152_v8  ;;  %v150_v22 = vld [vmem:[#allocation8 + $0x58] sm:$0xff]  ;;  %v149_v23 = vld [vmem:[#allocation8 + $0x50] sm:$0xff]  ;;  %v147_v25 = vld [vmem:[#allocation8 + $0x40] sm:$0xff] }
  0x17   :  { %100 = vmatpush.msra.mxu0 %v87_v4  ;;  %219 = vmatpush.msra.mxu2 %v87_v4  ;;  %v146_v26 = vld [vmem:[#allocation8 + $0x38] sm:$0xff]  ;;  %v145_v27 = vld [vmem:[#allocation8 + $0x30] sm:$0xff]  ;;  %v144_v28 = vld [vmem:[#allocation8 + $0x28] sm:$0xff] }
  0x18   :  { %158 = vmatpush.msra.mxu1 %v151_v10  ;;  %234 = vmatpush.msra.mxu3 %v151_v10  ;;  %v143_v29 = vld [vmem:[#allocation8 + $0x20] sm:$0xff]  ;;  %v142_v30 = vld [vmem:[#allocation8 + $0x18] sm:$0xff]  ;;  %v141_v31 = vld [vmem:[#allocation8 + $0x10] sm:$0xff] }
  0x19   :  { %101 = vmatpush.msra.mxu0 %v86_v7  ;;  %220 = vmatpush.msra.mxu2 %v86_v7  ;;  %v140_v32 = vld [vmem:[#allocation8 + $0x8] sm:$0xff]  ;;  %v139_v33 = vld [vmem:[#allocation8] sm:$0xff]  ;;  %v253_v34 = vld [vmem:[%s429_s2] ss:$0 sm:$0xff] }
  0x1a   :  { %159 = vmatpush.msra.mxu1 %v150_v22  ;;  %235 = vmatpush.msra.mxu3 %v150_v22  ;;  %v254_v57 = vld [vmem:[%s431_s4] ss:$0 sm:$0xff] }
  0x1b   :  { %102 = vmatpush.msra.mxu0 %v85_v9  ;;  %221 = vmatpush.msra.mxu2 %v85_v9 }
  0x1c   :  { %160 = vmatpush.msra.mxu1 %v149_v23  ;;  %236 = vmatpush.msra.mxu3 %v149_v23 }
  0x1d   :  { %103 = vmatpush.msra.mxu0 %v84_v11  ;;  %222 = vmatpush.msra.mxu2 %v84_v11 }
  0x1e   :  { %161 = vmatpush.msra.mxu1 %v148_v24  ;;  %237 = vmatpush.msra.mxu3 %v148_v24 }
  0x1f   :  { %104 = vmatpush.msra.mxu0 %v83_v12  ;;  %223 = vmatpush.msra.mxu2 %v83_v12 }
  0x20   :  { %162 = vmatpush.msra.mxu1 %v147_v25  ;;  %238 = vmatpush.msra.mxu3 %v147_v25 }
  0x21   :  { %105 = vmatpush.msra.mxu0 %v82_v13  ;;  %224 = vmatpush.msra.mxu2 %v82_v13 }
  0x22   :  { %163 = vmatpush.msra.mxu1 %v146_v26  ;;  %239 = vmatpush.msra.mxu3 %v146_v26 }
  0x23   :  { %106 = vmatpush.msra.mxu0 %v81_v14  ;;  %225 = vmatpush.msra.mxu2 %v81_v14 }
  0x24   :  { %164 = vmatpush.msra.mxu1 %v145_v27  ;;  %240 = vmatpush.msra.mxu3 %v145_v27 }
  0x25   :  { %107 = vmatpush.msra.mxu0 %v80_v15  ;;  %226 = vmatpush.msra.mxu2 %v80_v15 }
  0x26   :  { %165 = vmatpush.msra.mxu1 %v144_v28  ;;  %241 = vmatpush.msra.mxu3 %v144_v28 }
  0x27   :  { %108 = vmatpush.msra.mxu0 %v79_v16  ;;  %227 = vmatpush.msra.mxu2 %v79_v16 }
  0x28   :  { %166 = vmatpush.msra.mxu1 %v143_v29  ;;  %242 = vmatpush.msra.mxu3 %v143_v29 }
  0x29   :  { %109 = vmatpush.msra.mxu0 %v78_v17  ;;  %228 = vmatpush.msra.mxu2 %v78_v17 }
  0x2a   :  { %167 = vmatpush.msra.mxu1 %v142_v30  ;;  %243 = vmatpush.msra.mxu3 %v142_v30 }
  0x2b   :  { %110 = vmatpush.msra.mxu0 %v77_v18  ;;  %229 = vmatpush.msra.mxu2 %v77_v18 }
  0x2c   :  { %168 = vmatpush.msra.mxu1 %v141_v31  ;;  %244 = vmatpush.msra.mxu3 %v141_v31 }
  0x2d   :  { %111 = vmatpush.msra.mxu0 %v76_v19  ;;  %230 = vmatpush.msra.mxu2 %v76_v19 }
  0x2e   :  { %112 = vmatmul.f32.vlgmr.msra.gmra.mxu0 %v74_v20  ;;  %115 = vmatmul.f32.vlgmr.msra.gmra.mxu2 %v75_v21 }
  0x2f   :  { %169 = vmatpush.msra.mxu1 %v140_v32  ;;  %245 = vmatpush.msra.mxu3 %v140_v32 }
  0x31   :  { %170 = vmatpush.msra.mxu1 %v139_v33  ;;  %246 = vmatpush.msra.mxu3 %v139_v33 }
  0xab   :  { %v113_v35 = vpop.f32.mrf.mxu0 }
  0xac   :  { %v114_v36 = vadd.f32 %v253_v34, %v113_v35 }
  0xae   :  { %v119_v37 = vmul.f32 %v114_v36, %v114_v36  ;;  %v121_v50 = vmul.f32 0.5, %v114_v36 }
  0xb0   :  { %v123_v38 = vmul.f32 %v119_v37, %v114_v36 }
  0xb1   :  { %v116_v39 = vpop.f32.mrf.mxu2 }
  0xb2   :  { %v117_v40 = vadd.f32 %v253_v34, %v116_v39  ;;  %v125_v41 = vmul.f32 0.044715, %v123_v38 }
  0xb4   :  { %v120_v42 = vmul.f32 %v117_v40, %v117_v40  ;;  %v127_v43 = vadd.f32 %v125_v41, %v114_v36  ;;  %v122_v54 = vmul.f32 0.5, %v117_v40 }
  0xb6   :  { %v124_v44 = vmul.f32 %v120_v42, %v117_v40  ;;  %v129_v45 = vmul.f32 0.7978846, %v127_v43 }
  0xb8   :  { %255 = vtanh.f32 %v129_v45  ;;  %v126_v46 = vmul.f32 0.044715, %v124_v44 }
  0xba   :  { %v128_v47 = vadd.f32 %v126_v46, %v117_v40 }
  0xbc   :  { %v130_v48 = vmul.f32 0.7978846, %v128_v47 }
  0xbe   :  { %v256_v49 = vpop.eup %255  ;;  %257 = vtanh.f32 %v130_v48 }
  0xbf   :  { %v133_v51 = vadd.f32 1.0, %v256_v49 }
  0xc1   :  { %v135_v52 = vmul.f32 %v133_v51, %v121_v50 }
  0xc3   :  { %171 = vmatmul.f32.vlgmr.msra.gmra.mxu1 %v135_v52 }
  0xc4   :  { %v258_v53 = vpop.eup %257 }
  0xc5   :  { %v134_v55 = vadd.f32 1.0, %v258_v53 }
  0xc7   :  { %v136_v56 = vmul.f32 %v134_v55, %v122_v54 }
  0xc9   :  { %174 = vmatmul.f32.vlgmr.msra.gmra.mxu3 %v136_v56 }
 0x140   :  { %v172_v58 = vpop.f32.mrf.mxu1 }
 0x141   :  { %v191_v59 = vadd.f32 %v254_v57, %v172_v58 }
 0x143   :  { %193 = vst [vmem:[#allocation9] sm:$0xff] %v191_v59 }
 0x14c   :  { %v175_v60 = vpop.f32.mrf.mxu3 }
 0x14d   :  { %v192_v61 = vadd.f32 %v254_v57, %v175_v60 }
 0x14f   :  { %194 = vst [vmem:[#allocation9 + $0x8] sm:$0xff] %v192_v61 }
 0x150   :  { %207 = dma.vmem_to_hbm [thread:$0]  %s200_s11, 256, %s202_s14, [#allocation5], %s362_s26, %s362_s26, %s363_s27  }
 0x151   :  { %359 = dma.done.wait [#allocation5], 256  }
 0x152   :  { %360 = vsyncadd [#allocation5], 4294967040 }
 0x153   :  { %212 = vsyncpa [#allocation4], 1 }
 0x154   :  { %213 = vsyncpa [#allocation7], 1 }
 0x155   :  { %214 = vsyncpa [#allocation5], 1 }

</bundles_post_ra>
